<compile_context>
chip_gen: v5e
topology: v5e:2x2
jax: 0.10.0
libtpu: 0.0.40
codegen_flags: <defaults>
</compile_context>

<pallas_src>
import functools

import jax
import jax.numpy as jnp
from jax.experimental import pallas as pl
from jax.experimental.pallas import tpu as pltpu


def _round_up(x, m):
    return ((x + m - 1) // m) * m


def _make_category_encoder_kernel(v_chunk, v_total):
    """Kernel: per-token row selection from the fused [V, D] table."""

    def kernel(ids_ref, fused_ref, o_ref):
        ids = ids_ref[...]                                   # (tile_n, 1) int32
        tile_n = ids.shape[0]
        v_iota = jax.lax.broadcasted_iota(jnp.int32, (tile_n, v_chunk), 1)
        acc = None
        # Static Python loop over vocab chunks keeps the (tile_n, v_chunk)
        # one-hot working set bounded (vreg-sized) for larger vocabularies.
        for v0 in range(0, v_total, v_chunk):
            onehot = (ids == (v_iota + v0)).astype(fused_ref.dtype)
            part = jnp.dot(onehot, fused_ref[v0:v0 + v_chunk, :],
                           preferred_element_type=jnp.float32)
            acc = part if acc is None else acc + part
        o_ref[...] = acc.astype(o_ref.dtype)

    return kernel


def fold_category_encoder_weights(emb_table, w, b):
    """Fold Embedding @ Linear (+ bias) into one [V, D] table.

    Weights are static in eval mode -- do this once at model load, NOT per call.
    """
    fused = jnp.dot(emb_table, w, preferred_element_type=jnp.float32,
                    precision=jax.lax.Precision.HIGHEST)
    return (fused + b[None, :]).astype(jnp.float32)


@functools.partial(jax.jit, static_argnames=("tile_n",))
def category_encoder_forward(categories, fused, *, tile_n=1024):
    """Pallas forward pass of CategoryEncoder (eval mode).

    categories: [B, S] int32 token ids
    fused     : [V, D] float32 pre-folded table (emb_table @ w + b)
    returns   : [B, S, D] float32
    """
    B, S = categories.shape
    V, D = fused.shape
    N = B * S

    # Vocab chunking: 512 is a multiple of 128 (v5e MXU K) and 256 (v6e/v7x MXU K).
    V_CHUNK = 512
    if V <= V_CHUNK:
        V_pad, v_chunk = V, V
    else:
        V_pad, v_chunk = _round_up(V, V_CHUNK), V_CHUNK
        if V_pad != V:
            # Zero rows; ids < V so they are never selected (exact).
            fused = jnp.pad(fused, ((0, V_pad - V), (0, 0)))

    # Big, sublane-aligned token tiles; clamp to the (padded) problem size.
    tile_n_eff = min(tile_n, _round_up(N, 8))
    N_pad = _round_up(N, tile_n_eff)
    ids = categories.reshape(N).astype(jnp.int32)
    if N_pad != N:
        ids = jnp.pad(ids, (0, N_pad - N))        # pad with id 0; rows sliced off below
    ids = ids.reshape(N_pad, 1)

    grid = (N_pad // tile_n_eff,)

    # ---- VMEM budget derived from the actual device (v7x: 64 MiB per TC). ----
    try:
        vmem_cap = pltpu.get_tpu_info().vmem_capacity_bytes
    except Exception:
        vmem_cap = 64 << 20                        # conservative (v7x per-TensorCore)
    est_vmem = (
        4 * 2 * V_pad * D                          # fused table (double-buffered, grid-constant)
        + 4 * 2 * tile_n_eff * D                   # output tiles (double-buffered)
        + 4 * 2 * tile_n_eff                       # ids tiles (double-buffered)
        + 8 * tile_n_eff * v_chunk                 # one-hot (f32) + int32 iota working set
    )
    vmem_budget = vmem_cap - (8 << 20)             # headroom for Mosaic internals
    if est_vmem > vmem_budget:
        # TODO(synk): switch to HBM-resident fused table + scalar-prefetch /
        # make_async_copy row gather for vocabularies that do not fit VMEM.
        raise NotImplementedError(
            "fused table + one-hot working set exceed per-core VMEM; "
            "HBM gather path not implemented")
    vmem_limit = int(min(vmem_budget, max(8 << 20, 2 * est_vmem)))

    flops = 2 * N_pad * V_pad * D
    bytes_accessed = 4 * (N_pad + V_pad * D + N_pad * D)

    out = pl.pallas_call(
        _make_category_encoder_kernel(v_chunk, V_pad),
        out_shape=jax.ShapeDtypeStruct((N_pad, D), jnp.float32),
        grid=grid,
        in_specs=[
            pl.BlockSpec((tile_n_eff, 1), lambda i: (i, 0)),   # ids tile
            # Grid-constant fused table: block index never changes, so Pallas
            # fetches it once per core (only the buffer is double-allocated).
            pl.BlockSpec((V_pad, D), lambda i: (0, 0)),
        ],
        # Unpadded output: no 4x write amplification, no post-kernel slice copy.
        out_specs=pl.BlockSpec((tile_n_eff, D), lambda i: (i, 0)),
        compiler_params=pltpu.CompilerParams(
            dimension_semantics=("parallel",),
            vmem_limit_bytes=vmem_limit),
        cost_estimate=pl.CostEstimate(
            flops=int(flops), transcendentals=0,
            bytes_accessed=int(bytes_accessed)),
    )(ids, fused)

    if N_pad != N:
        out = out[:N]
    return out.reshape(B, S, D)


def _reference_forward(categories, emb_table, w, b):
    emb = jnp.take(emb_table, categories, axis=0)                  # nn.Embedding
    return jnp.einsum("bse,ed->bsd", emb, w,
                      precision=jax.lax.Precision.HIGHEST) + b     # nn.Linear (+ identity dropout)


if __name__ == "__main__":
    # small, deterministic setup
    B, S = 2, 8            # batch, seq of category ids
    V, E, D = 32, 64, 32   # vocab, category_embed_dim, output_dim
    pad_token_id = 0

    key = jax.random.PRNGKey(0)
    k_emb, k_w, k_b, k_ids = jax.random.split(key, 4)

    # deterministic "pretrained" category embedding (stand-in for np.load(category_embed))
    emb_table = jax.random.normal(k_emb, (V, E), dtype=jnp.float32) * 0.02
    # reduce_dim: nn.Linear(E, D); weight stored transposed as [E, D]
    w = jax.random.normal(k_w, (E, D), dtype=jnp.float32) * (1.0 / jnp.sqrt(E))
    b = jax.random.normal(k_b, (D,), dtype=jnp.float32) * 0.01

    categories = jax.random.randint(k_ids, (B, S), 0, V, dtype=jnp.int32)
    categories = categories.at[0, -1].set(pad_token_id)   # include a pad token

    # Fold once at "model load" time (weights are static in eval mode).
    fused = fold_category_encoder_weights(emb_table, w, b)

    out = category_encoder_forward(categories, fused)
    out = jax.block_until_ready(out)

    ref = _reference_forward(categories, emb_table, w, b)
    assert out.shape == (B, S, D), out.shape
    assert jnp.allclose(out, ref, atol=1e-5, rtol=1e-5), "mismatch vs reference"

    print("KERNEL_OK")
</pallas_src>

<mosaic_0001>
module attributes {stable_mosaic.version = 11 : i64} {
  func.func @kernel(%arg0: i32, %arg1: memref<16x1xi32, #tpu.memory_space<vmem>>, %arg2: memref<32x32xf32, #tpu.memory_space<vmem>>, %arg3: memref<16x32xf32, #tpu.memory_space<vmem>>) attributes {dimension_semantics = [#tpu.dimension_semantics<parallel>], iteration_bounds = array<i64: 1>, scalar_prefetch = 0 : i64, scratch_operands = 0 : i64, tpu.core_type = #tpu.core_type<tc>, window_params = [{transform_indices = @transform_0, window_bounds = array<i64: 16, 1>}, {pipeline_mode = #tpu.pipeline_mode<synchronous>, transform_indices = @transform_1, window_bounds = array<i64: 32, 32>}, {transform_indices = @transform_2, window_bounds = array<i64: 16, 32>}]} {
    %c0 = arith.constant 0 : index
    %c0_0 = arith.constant 0 : index
    %0 = vector.load %arg1[%c0, %c0_0] : memref<16x1xi32, #tpu.memory_space<vmem>>, vector<16x1xi32>
    %1 = tpu.iota {dimensions = array<i32: 1>} : vector<16x32xi32>
    %c0_i32 = arith.constant 0 : i32
    %2 = vector.broadcast %c0_i32 : i32 to vector<16x32xi32>
    %3 = arith.addi %1, %2 : vector<16x32xi32>
    %4 = vector.broadcast %0 : vector<16x1xi32> to vector<16x32xi32>
    %5 = arith.cmpi eq, %4, %3 : vector<16x32xi32>
    %6 = arith.extui %5 : vector<16x32xi1> to vector<16x32xi32>
    %7 = arith.sitofp %6 : vector<16x32xi32> to vector<16x32xf32>
    %c0_1 = arith.constant 0 : index
    %c0_2 = arith.constant 0 : index
    %8 = vector.load %arg2[%c0_1, %c0_2] : memref<32x32xf32, #tpu.memory_space<vmem>>, vector<32x32xf32>
    %cst = arith.constant dense<0.000000e+00> : vector<16x32xf32>
    %9 = tpu.matmul %7, %8, %cst {dimension_numbers = #tpu.dot_dimension_numbers<[1], [0], [0], [1], [0, 0, 1, 1], [], []>} : vector<16x32xf32>, vector<32x32xf32>, vector<16x32xf32> -> vector<16x32xf32>
    %c0_3 = arith.constant 0 : index
    %c0_4 = arith.constant 0 : index
    %10 = vector.load %arg3[%c0_3, %c0_4] : memref<16x32xf32, #tpu.memory_space<vmem>>, vector<16x32xf32>
    tpu.vector_store %arg3[%c0_3, %c0_4], %9 {strides = array<i32>} : memref<16x32xf32, #tpu.memory_space<vmem>>, vector<16x32xf32>,
    return
  }
  func.func @transform_0(%arg0: i32) -> (i32, i32) {
    %c0_i32 = arith.constant 0 : i32
    %c0_i32_0 = arith.constant 0 : i32
    return %arg0, %c0_i32 : i32, i32
  }
  func.func @transform_1(%arg0: i32) -> (i32, i32) {
    %c0_i32 = arith.constant 0 : i32
    %c0_i32_0 = arith.constant 0 : i32
    %c0_i32_1 = arith.constant 0 : i32
    return %c0_i32, %c0_i32_0 : i32, i32
  }
  func.func @transform_2(%arg0: i32) -> (i32, i32) {
    %c0_i32 = arith.constant 0 : i32
    %c0_i32_0 = arith.constant 0 : i32
    return %arg0, %c0_i32 : i32, i32
  }
}

</mosaic_0001>

<bundles_post_ra>
// kernel: category_encoder_forward.1
= control target key start
LH: loop header
LB: loop body
LE: loop exit
PB: predicated region body
PF: predicated region fallthrough
CT: control target
= control target key end

     0   :  { %7 = vsyncpa [#allocation3], 0  ;;  %s209_s0 = inlined_call_operand.vmem [shape: s32[16,1], index: 0, kind: input, shape index: {}]   ;;  %s210_s1 = inlined_call_operand.hbm [shape: f32[32,32], index: 1, kind: input, shape index: {}]   ;;  %s211_s2 = inlined_call_operand.hbm [shape: f32[16,32], index: 2, kind: output, shape index: {}]  }
   0x1   :  { %8 = vsyncpa [#allocation4], 0  ;;  %s15_s11 = sshll.u32 %s210_s1, 4  ;;  %s166_s12 = smov [#allocation2]   ;;  %s16_s11 = int_to_ptr.hbm [resolvable:$true] %s15_s11 }
   0x2   :  { %s17_s13 = sshll.u32 %s166_s12, 4  ;;  %s167_s14 = smov 128   ;;  %s18_s13 = int_to_ptr.vmem [resolvable:$true] %s17_s13 }
   0x3   :  { %s168_s15 = smov 8  }
   0x4   :  { %23 = dma.hbm_to_vmem [thread:$0]  %s16_s11, 512, %s18_s13, [#allocation3], %s167_s14, %s167_s14, %s168_s15  }
   0x5   :  { %162 = dma.done.wait [#allocation3], 512  }
   0x6   :  { %163 = vsyncadd [#allocation3], 4294966784  ;;  %v169_v0 = vmov 0   ;;  %v28_v1 = vld [vmem:[%s209_s0] sm:$0xff]  ;;  %v47_v2 = vld [vmem:[#allocation2 + $0x18] sm:$0xff]  ;;  %v30_v7 = vlaneseq  ;;  %vm48_vm0 = vcmask 261120  }
   0x7   :  { %113 = vset.pattern.permute.xlu0 %v169_v0  ;;  %67 = vmatpush.msra.mxu0 %v47_v2  ;;  %v46_v3 = vld [vmem:[#allocation2 + $0x10] sm:$0xff]  ;;  %v45_v4 = vld [vmem:[#allocation2 + $0x8] sm:$0xff]  ;;  %v44_v6 = vld [vmem:[#allocation2] sm:$0xff]  ;;  %v170_v10 = vmov 0.0   ;;  %s86_s22 = sshll.u32 %s211_s2, 4  ;;  %s87_s22 = int_to_ptr.hbm [resolvable:$true] %s86_s22 }
   0x8   :  { %33 = vperm.xlu0 %113, %v28_v1   ;;  %103 = vmatpush.msra.mxu1 %v47_v2  ;;  %v29_v5 = vld [vmem:[%s209_s0 + $0x8] sm:$0xff]  ;;  %v31_v8 = vand.u32 127, %v30_v7  ;;  %s171_s0 = smov [#allocation5]  }
   0x9   :  { %68 = vmatpush.msra.mxu0 %v46_v3  ;;  %s84_s19 = sshll.u32 %s171_s0, 4  ;;  %s85_s19 = int_to_ptr.vmem [resolvable:$true] %s84_s19 }
   0xa   :  { %104 = vmatpush.msra.mxu1 %v46_v3 }
   0xb   :  { %69 = vmatpush.msra.mxu0 %v45_v4 }
   0xc   :  { %105 = vmatpush.msra.mxu1 %v45_v4 }
   0xd   :  { %70 = vmatpush.msra.mxu0 %v44_v6 }
   0xe   :  { %106 = vmatpush.msra.mxu1 %v44_v6 }
  0x10   :  { %36 = vperm.xlu0 %113, %v29_v5  }
  0x7a   :  { %v34_v9 = vpop.permute.xlu0 %33 }
  0x7b   :  { %vm38_vm1 = vcmp.eq.s32.totalorder %v34_v9, %v31_v8 }
  0x7c   :  { %v99_v11 = vsel %vm38_vm1, 1.0, %v170_v10 }
  0x7d   :  { %101 = vmatmul.msk.f32.vlgmr.msra.gmra.mxu0 %vm48_vm0, %v99_v11 }
  0x82   :  { %v37_v12 = vpop.permute.xlu0 %36 }
  0x83   :  { %vm39_vm2 = vcmp.eq.s32.totalorder %v37_v12, %v31_v8 }
  0x84   :  { %v100_v13 = vsel %vm39_vm2, 1.0, %v170_v10 }
  0x85   :  { %102 = vmatmul.msk.f32.vlgmr.msra.gmra.mxu1 %vm48_vm0, %v100_v13 }
  0xfa   :  { %v72_v14 = vpop.f32.mrf.mxu0 }
  0xfb   :  { %78 = vst.msk [vmem:[#allocation5] sm:$0xff] %vm48_vm0, %v72_v14 }
 0x102   :  { %v75_v15 = vpop.f32.mrf.mxu1 }
 0x103   :  { %79 = vst.msk [vmem:[#allocation5 + $0x8] sm:$0xff] %vm48_vm0, %v75_v15 }
 0x104   :  { %92 = dma.vmem_to_hbm [thread:$0]  %s85_s19, 256, %s87_s22, [#allocation4], %s167_s14, %s167_s14, %s168_s15  }
 0x105   :  { %164 = dma.done.wait [#allocation4], 256  }
 0x106   :  { %165 = vsyncadd [#allocation4], 4294967040 }
 0x107   :  { %97 = vsyncpa [#allocation3], 1 }
 0x108   :  { %98 = vsyncpa [#allocation4], 1 }

</bundles_post_ra>
